<compile_context>
chip_gen: v6e
topology: v6e:2x2x1
jax: 0.10.0
libtpu: 0.0.40
codegen_flags: <defaults>
</compile_context>

<pallas_src>
import jax
import jax.numpy as jnp
from jax.experimental import pallas as pl
from jax.experimental.pallas import tpu as pltpu


def _round_up(x, m):
    return (x + m - 1) // m * m


def _cdiv(a, b):
    return -(-a // b)


def _mlp_kernel(y_ref, w1_ref, b1_ref, w2_ref, b2_ref, o_ref):
    # y: (T, K)  w1: (K, H)  b1: (1, H)  w2: (H, N)  b2: (1, N)  o: (T, N)
    y = y_ref[...].astype(w1_ref.dtype)                 # in-kernel cast (free VPU op)
    h = jnp.dot(y, w1_ref[...], preferred_element_type=jnp.float32) + b1_ref[...]
    h = h * jax.nn.sigmoid(h)                           # SiLU, f32 epilogue (v5e-safe)
    # NOTE: casting the SiLU output to the weight dtype is a deliberate activation
    # quantization when matmul_dtype=bf16 (dominant source of the bf16 drift).
    z = jnp.dot(h.astype(w2_ref.dtype), w2_ref[...],
                preferred_element_type=jnp.float32) + b2_ref[...]
    o_ref[...] = jnp.tanh(z).astype(o_ref.dtype)        # Tanh on EUP, f32


def _choose_tile_rows(rows, align=8, max_tile=2048, split_rows=1024):
    """Largest aligned row tile (<= max_tile); for big batches force >= 2 grid
    steps so both v7x TensorCores get 'parallel' work."""
    tile = min(_round_up(rows, align), max_tile)
    if rows >= split_rows and _cdiv(rows, tile) < 2:
        tile = _round_up(_cdiv(rows, 2), align)
    return tile


def _run_mlp(y2d, w1, b1, w2, b2, tile_rows, out_dtype):
    rows, k_in = y2d.shape
    hp = w1.shape[1]
    n_out = w2.shape[1]
    assert rows % tile_rows == 0
    grid = (rows // tile_rows,)

    w_itemsize = jnp.dtype(w1.dtype).itemsize
    cost = pl.CostEstimate(
        flops=2 * rows * hp * (k_in + n_out) + rows * (3 * hp + n_out),
        transcendentals=rows * (hp + n_out),
        bytes_accessed=(y2d.size * jnp.dtype(y2d.dtype).itemsize
                        + rows * n_out * jnp.dtype(out_dtype).itemsize
                        + (w1.size + w2.size) * w_itemsize
                        + (b1.size + b2.size) * 4),
    )

    return pl.pallas_call(
        _mlp_kernel,
        out_shape=jax.ShapeDtypeStruct((rows, n_out), out_dtype),
        grid_spec=pltpu.PrefetchScalarGridSpec(
            num_scalar_prefetch=0,
            grid=grid,
            in_specs=[
                pl.BlockSpec((tile_rows, k_in), lambda i: (i, 0)),   # activations
                pl.BlockSpec((k_in, hp), lambda i: (0, 0)),          # W1 (VMEM-resident)
                pl.BlockSpec((1, hp), lambda i: (0, 0)),             # b1 (resident)
                pl.BlockSpec((hp, n_out), lambda i: (0, 0)),         # W2 (resident)
                pl.BlockSpec((1, n_out), lambda i: (0, 0)),          # b2 (resident)
            ],
            out_specs=pl.BlockSpec((tile_rows, n_out), lambda i: (i, 0)),
        ),
        compiler_params=pltpu.CompilerParams(
            dimension_semantics=("parallel",),       # independent batch tiles
            vmem_limit_bytes=32 * 1024 * 1024,       # big tiles; <= v7x scoped max
        ),
        cost_estimate=cost,
    )(y2d, w1, b1, w2, b2)


def prior_model_bellman_forward(y, w1, b1, w2, b2, *, matmul_dtype=None,
                                out_dtype=jnp.float32, tile_rows=None,
                                block_diag_threshold=256, max_tile_rows=2048):
    """Pallas forward pass: Tanh(SiLU(y @ w1 + b1) @ w2 + b2).

    y: (B, D);  w1: (D, H);  b1: (H,)/(1,H);  w2: (H, D);  b2: (D,)/(1,D)
    matmul_dtype: optional low-precision MXU input dtype (jnp.bfloat16 on
      v6e/v7x).  Weights are pre-cast once here; the activation cast happens on
      the VMEM tile inside the kernel.  Accumulation + SiLU/Tanh stay f32.
    out_dtype: set to jnp.bfloat16 to halve output writeback if downstream allows.
    """
    B, D = y.shape
    H = w1.shape[1]
    assert w1.shape == (D, H) and w2.shape == (H, D)

    w_dtype = matmul_dtype if matmul_dtype is not None else jnp.float32

    # Lane-align the hidden dim (320 -> 384).  Zero padding is exact: padded b1
    # entries give SiLU(0) = 0 and padded W2 rows are zero.
    hp = _round_up(H, 128)
    w1p = jnp.zeros((D, hp), w_dtype).at[:, :H].set(w1.astype(w_dtype))
    w2p = jnp.zeros((hp, D), w_dtype).at[:H, :].set(w2.astype(w_dtype))
    b1p = jnp.zeros((1, hp), jnp.float32).at[:, :H].set(
        b1.reshape(1, H).astype(jnp.float32))
    b2p = b2.reshape(1, D).astype(jnp.float32)

    pack = 128 // D if (D < 128 and 128 % D == 0) else 1
    use_block_diag = pack > 1 and B >= block_diag_threshold

    if use_block_diag:
        # Lane-dense path: fold `pack` batch rows into the 128-lane axis (free
        # row-major reshape in XLA) and expand the weights to pack-x
        # block-diagonal so the kernel needs no reshape and the MXU sees
        # K = pack*D = 128 / N = pack*Hp instead of 16-wide tiles.
        eye = jnp.eye(pack, dtype=w_dtype)
        w1k = jnp.kron(eye, w1p)                 # (pack*D, pack*Hp), ~1.5-3 MiB
        w2k = jnp.kron(eye, w2p)                 # (pack*Hp, pack*D)
        b1k = jnp.tile(b1p, (1, pack))
        b2k = jnp.tile(b2p, (1, pack))

        rows = _cdiv(B, pack)
        tr = tile_rows if tile_rows is not None else _choose_tile_rows(
            rows, align=8,
            max_tile=max(8, max_tile_rows // pack),
            split_rows=max(8, 1024 // pack))
        rows_pad = _round_up(rows, tr)
        b_pad = rows_pad * pack
        yp = y if b_pad == B else jnp.zeros((b_pad, D), y.dtype).at[:B].set(y)
        y2d = yp.reshape(rows_pad, pack * D)     # free layout fold in XLA

        out2d = _run_mlp(y2d, w1k, b1k, w2k, b2k, tr, out_dtype)
        return out2d.reshape(b_pad, D)[:B]       # free layout unfold in XLA

    # Small-B / generic path: plain (tile, D) tiles; single grid step for the
    # shipped B=16 latency case (dispatch-bound anyway).
    tr = tile_rows if tile_rows is not None else _choose_tile_rows(
        B, align=8, max_tile=max_tile_rows, split_rows=1024)
    b_pad = _round_up(B, tr)
    yp = y if b_pad == B else jnp.zeros((b_pad, D), y.dtype).at[:B].set(y)
    out = _run_mlp(yp, w1p, b1p, w2p, b2p, tr, out_dtype)
    return out[:B]


def extrinsic_kl(y, w1, b1, w2, b2, **kwargs):
    return 1.0 - prior_model_bellman_forward(y, w1, b1, w2, b2, **kwargs)


def reference_forward(y, w1, b1, w2, b2):
    hi = jax.lax.Precision.HIGHEST
    h = jnp.dot(y, w1, precision=hi) + b1.reshape(1, -1)
    h = h * jax.nn.sigmoid(h)
    z = jnp.dot(h, w2, precision=hi) + b2.reshape(1, -1)
    return jnp.tanh(z)


if __name__ == "__main__":
    # Shapes consistent with the module: observation_dim = 16, hidden = 20*16.
    D = 16
    H = D * 20                                   # 320 (padded to 384 internally)

    key = jax.random.PRNGKey(0)
    k_y, k_w1, k_b1, k_w2, k_b2, k_big = jax.random.split(key, 6)

    s1 = 1.0 / (D ** 0.5)
    s2 = 1.0 / (H ** 0.5)
    w1 = jax.random.uniform(k_w1, (D, H), jnp.float32, -s1, s1)
    b1 = jax.random.uniform(k_b1, (H,), jnp.float32, -s1, s1)
    w2 = jax.random.uniform(k_w2, (H, D), jnp.float32, -s2, s2)
    b2 = jax.random.uniform(k_b2, (D,), jnp.float32, -s2, s2)

    # Shipped latency case: B = 16 -> plain path, single grid step.
    y_small = jax.random.normal(k_y, (16, D), jnp.float32)
    ref_small = reference_forward(y_small, w1, b1, w2, b2)
    out_small = jax.block_until_ready(
        prior_model_bellman_forward(y_small, w1, b1, w2, b2))
    assert out_small.shape == (16, D)
    assert jnp.allclose(out_small, ref_small, atol=1e-3, rtol=1e-3), \
        "small-B f32 kernel mismatch vs reference"

    # Throughput case: B = 1024 -> lane-dense block-diagonal path, multi-step grid.
    y_big = jax.random.normal(k_big, (1024, D), jnp.float32)
    ref_big = reference_forward(y_big, w1, b1, w2, b2)
    out_big = jax.block_until_ready(
        prior_model_bellman_forward(y_big, w1, b1, w2, b2))
    assert out_big.shape == (1024, D)
    assert jnp.allclose(out_big, ref_big, atol=1e-3, rtol=1e-3), \
        "block-diag f32 kernel mismatch vs reference"

    # bf16 MXU fast path (v6e/v7x): weights pre-cast once, activations cast in-kernel,
    # f32 accumulation + f32 SiLU/Tanh epilogue.
    out_bf16 = jax.block_until_ready(
        prior_model_bellman_forward(y_big, w1, b1, w2, b2,
                                    matmul_dtype=jnp.bfloat16))
    assert out_bf16.shape == (1024, D)
    assert jnp.allclose(out_bf16, ref_big, atol=5e-2), "bf16 kernel drift too large"

    # extrinsic_kl(y) = 1 - forward(y): trivial glue outside the kernel.
    kl = jax.block_until_ready(extrinsic_kl(y_small, w1, b1, w2, b2))
    assert kl.shape == (16, D)

    print("KERNEL_OK")
</pallas_src>

<mosaic_0001>
module attributes {stable_mosaic.version = 11 : i64} {
  func.func @_mlp_kernel(%arg0: i32, %arg1: memref<16x16xf32, #tpu.memory_space<vmem>>, %arg2: memref<16x384xf32, #tpu.memory_space<vmem>>, %arg3: memref<1x384xf32, #tpu.memory_space<vmem>>, %arg4: memref<384x16xf32, #tpu.memory_space<vmem>>, %arg5: memref<1x16xf32, #tpu.memory_space<vmem>>, %arg6: memref<16x16xf32, #tpu.memory_space<vmem>>) attributes {dimension_semantics = [#tpu.dimension_semantics<parallel>], iteration_bounds = array<i64: 1>, scalar_prefetch = 0 : i64, scratch_operands = 0 : i64, tpu.core_type = #tpu.core_type<tc>, window_params = [{transform_indices = @transform_0, window_bounds = array<i64: 16, 16>}, {pipeline_mode = #tpu.pipeline_mode<synchronous>, transform_indices = @transform_1, window_bounds = array<i64: 16, 384>}, {pipeline_mode = #tpu.pipeline_mode<synchronous>, transform_indices = @transform_2, window_bounds = array<i64: 1, 384>}, {pipeline_mode = #tpu.pipeline_mode<synchronous>, transform_indices = @transform_3, window_bounds = array<i64: 384, 16>}, {pipeline_mode = #tpu.pipeline_mode<synchronous>, transform_indices = @transform_4, window_bounds = array<i64: 1, 16>}, {transform_indices = @transform_5, window_bounds = array<i64: 16, 16>}]} {
    %c0 = arith.constant 0 : index
    %c0_0 = arith.constant 0 : index
    %0 = vector.load %arg1[%c0, %c0_0] : memref<16x16xf32, #tpu.memory_space<vmem>>, vector<16x16xf32>
    %c0_1 = arith.constant 0 : index
    %c0_2 = arith.constant 0 : index
    %1 = vector.load %arg2[%c0_1, %c0_2] : memref<16x384xf32, #tpu.memory_space<vmem>>, vector<16x384xf32>
    %cst = arith.constant dense<0.000000e+00> : vector<16x384xf32>
    %2 = tpu.matmul %0, %1, %cst {dimension_numbers = #tpu.dot_dimension_numbers<[1], [0], [0], [1], [0, 0, 1, 1], [], []>} : vector<16x16xf32>, vector<16x384xf32>, vector<16x384xf32> -> vector<16x384xf32>
    %c0_3 = arith.constant 0 : index
    %c0_4 = arith.constant 0 : index
    %3 = vector.load %arg3[%c0_3, %c0_4] : memref<1x384xf32, #tpu.memory_space<vmem>>, vector<1x384xf32>
    %4 = vector.broadcast %3 : vector<1x384xf32> to vector<16x384xf32>
    %5 = arith.addf %2, %4 : vector<16x384xf32>
    %6 = arith.negf %5 : vector<16x384xf32>
    %7 = math.exp %6 : vector<16x384xf32>
    %cst_5 = arith.constant 1.000000e+00 : f32
    %8 = vector.broadcast %cst_5 : f32 to vector<16x384xf32>
    %9 = arith.addf %8, %7 : vector<16x384xf32>
    %10 = arith.divf %8, %9 : vector<16x384xf32>
    %11 = arith.mulf %5, %10 : vector<16x384xf32>
    %c0_6 = arith.constant 0 : index
    %c0_7 = arith.constant 0 : index
    %12 = vector.load %arg4[%c0_6, %c0_7] : memref<384x16xf32, #tpu.memory_space<vmem>>, vector<384x16xf32>
    %cst_8 = arith.constant dense<0.000000e+00> : vector<16x16xf32>
    %13 = tpu.matmul %11, %12, %cst_8 {dimension_numbers = #tpu.dot_dimension_numbers<[1], [0], [0], [1], [0, 0, 1, 1], [], []>} : vector<16x384xf32>, vector<384x16xf32>, vector<16x16xf32> -> vector<16x16xf32>
    %c0_9 = arith.constant 0 : index
    %c0_10 = arith.constant 0 : index
    %14 = vector.load %arg5[%c0_9, %c0_10] : memref<1x16xf32, #tpu.memory_space<vmem>>, vector<1x16xf32>
    %15 = vector.broadcast %14 : vector<1x16xf32> to vector<16x16xf32>
    %16 = arith.addf %13, %15 : vector<16x16xf32>
    %17 = math.tanh %16 : vector<16x16xf32>
    %c0_11 = arith.constant 0 : index
    %c0_12 = arith.constant 0 : index
    %18 = vector.load %arg6[%c0_11, %c0_12] : memref<16x16xf32, #tpu.memory_space<vmem>>, vector<16x16xf32>
    tpu.vector_store %arg6[%c0_11, %c0_12], %17 {strides = array<i32>} : memref<16x16xf32, #tpu.memory_space<vmem>>, vector<16x16xf32>,
    return
  }
  func.func @transform_0(%arg0: i32) -> (i32, i32) {
    %c0_i32 = arith.constant 0 : i32
    %c0_i32_0 = arith.constant 0 : i32
    return %arg0, %c0_i32 : i32, i32
  }
  func.func @transform_1(%arg0: i32) -> (i32, i32) {
    %c0_i32 = arith.constant 0 : i32
    %c0_i32_0 = arith.constant 0 : i32
    %c0_i32_1 = arith.constant 0 : i32
    return %c0_i32, %c0_i32_0 : i32, i32
  }
  func.func @transform_2(%arg0: i32) -> (i32, i32) {
    %c0_i32 = arith.constant 0 : i32
    %c0_i32_0 = arith.constant 0 : i32
    %c0_i32_1 = arith.constant 0 : i32
    return %c0_i32, %c0_i32_0 : i32, i32
  }
  func.func @transform_3(%arg0: i32) -> (i32, i32) {
    %c0_i32 = arith.constant 0 : i32
    %c0_i32_0 = arith.constant 0 : i32
    %c0_i32_1 = arith.constant 0 : i32
    return %c0_i32, %c0_i32_0 : i32, i32
  }
  func.func @transform_4(%arg0: i32) -> (i32, i32) {
    %c0_i32 = arith.constant 0 : i32
    %c0_i32_0 = arith.constant 0 : i32
    %c0_i32_1 = arith.constant 0 : i32
    return %c0_i32, %c0_i32_0 : i32, i32
  }
  func.func @transform_5(%arg0: i32) -> (i32, i32) {
    %c0_i32 = arith.constant 0 : i32
    %c0_i32_0 = arith.constant 0 : i32
    return %arg0, %c0_i32 : i32, i32
  }
}

</mosaic_0001>

<bundles_post_ra>
// kernel: tpu_custom_call.1
= control target key start
LH: loop header
LB: loop body
LE: loop exit
PB: predicated region body
PF: predicated region fallthrough
CT: control target
= control target key end

     0   :  { %vm46_vm0 = vcmask 130048   ;;  %s856_s0 = inlined_call_operand.vmem [shape: f32[16,16], index: 0, kind: input, shape index: {}]   ;;  %s857_s1 = inlined_call_operand.vmem [shape: f32[16,384], index: 1, kind: input, shape index: {}]   ;;  %s858_s2 = inlined_call_operand.vmem [shape: f32[1,384], index: 2, kind: input, shape index: {}]   ;;  %s859_s3 = inlined_call_operand.vmem [shape: f32[384,16], index: 3, kind: input, shape index: {}]   ;;  %s860_s4 = inlined_call_operand.vmem [shape: f32[1,16], index: 4, kind: input, shape index: {}]   ;;  %s861_s5 = inlined_call_operand.hbm [shape: f32[16,16], index: 5, kind: output, shape index: {}]  }
   0x1   :  { %v27_v0 = vld [vmem:[%s857_s1 + $0x20] sm:$0xff]  ;;  %v28_v1 = vld [vmem:[%s857_s1 + $0x28] sm:$0xff]  ;;  %v26_v2 = vld [vmem:[%s857_s1 + $0x18] sm:$0xff] }
   0x2   :  { %81 = vmatprep.subr.mxu0 %v27_v0  ;;  %543 = vmatprep.subr.mxu1 %v28_v1  ;;  %v24_v3 = vld [vmem:[%s857_s1 + $0x8] sm:$0xff]  ;;  %v25_v4 = vld [vmem:[%s857_s1 + $0x10] sm:$0xff]  ;;  %v23_v5 = vld [vmem:[%s857_s1] sm:$0xff] }
   0x3   :  { %82 = vmatpush1.msra.mxu0 %v26_v2  ;;  %544 = vmatpush3.msra.mxu1 %v28_v1  ;;  %v21_v6 = vld [vmem:[%s856_s0] sm:$0xff]  ;;  %v22_v7 = vld [vmem:[%s856_s0 + $0x8] sm:$0xff] }
   0x4   :  { %83 = vmatprep.subr.mxu0 %v24_v3  ;;  %545 = vmatprep.subr.mxu1 %v25_v4 }
   0x5   :  { %10 = vsyncpa [#allocation3], 0  ;;  %84 = vmatpush1.msra.mxu0 %v23_v5  ;;  %v639_v8 = vmov 0.0   ;;  %546 = vmatpush3.msra.mxu1 %v25_v4  ;;  %v278_v9 = vld [vmem:[%s859_s3 + $0xf8] sm:$0xff]  ;;  %v277_v12 = vld [vmem:[%s859_s3 + $0xf0] sm:$0xff]  ;;  %v31_v57 = vlaneseq  ;;  %s640_s24 = smov [#allocation2]  }
   0x6   :  { %117 = vmatprep.mubr.f32.mxu0 %v639_v8  ;;  %547 = vmatprep.mubr.msk.f32.mxu1 %vm46_vm0, %v21_v6  ;;  %v294_v10 = vld [vmem:[%s859_s3 + $0x178] sm:$0xff]  ;;  %v293_v13 = vld [vmem:[%s859_s3 + $0x170] sm:$0xff]  ;;  %v276_v15 = vld [vmem:[%s859_s3 + $0xe8] sm:$0xff]  ;;  %s461_s25 = sshll.u32 %s640_s24, 4  ;;  %s462_s25 = int_to_ptr.vmem [resolvable:$true] %s461_s25 }
   0x7   :  { %472 = vmatmul.mubr.msk.f32.vlgmr.msra.gmra.mxu0 %vm46_vm0, %v21_v6  ;;  %548 = vmatmul.mubr.msk.f32.vlgmr.msra.gmra.mxu1 %vm46_vm0, %v22_v7  ;;  %v262_v11 = vld [vmem:[%s859_s3 + $0x78] sm:$0xff]  ;;  %v261_v14 = vld [vmem:[%s859_s3 + $0x70] sm:$0xff]  ;;  %v292_v16 = vld [vmem:[%s859_s3 + $0x168] sm:$0xff]  ;;  %v32_v58 = vshrl.u32 %v31_v57, 7  ;;  %p622_p1 = scmp.lt.s32.totalorder %s462_s25, %s462_s25 }
   0x8   :  { %123 = vmatprep.mubr.f32.mxu0 %v639_v8  ;;  %487 = vmatprep.subr.mxu0 %v278_v9  ;;  %v260_v17 = vld [vmem:[%s859_s3 + $0x68] sm:$0xff]  ;;  %v275_v18 = vld [vmem:[%s859_s3 + $0xe0] sm:$0xff]  ;;  %v274_v21 = vld [vmem:[%s859_s3 + $0xd8] sm:$0xff] }
   0x9   :  { %550 = vmatprep.subr.mxu1 %v294_v10  ;;  %488 = vmatpush3.msra.mxu0 %v262_v11  ;;  %v291_v19 = vld [vmem:[%s859_s3 + $0x160] sm:$0xff]  ;;  %v290_v22 = vld [vmem:[%s859_s3 + $0x158] sm:$0xff]  ;;  %v273_v24 = vld [vmem:[%s859_s3 + $0xd0] sm:$0xff]  ;;  %v33_v59 = vsub.s32 0, %v32_v58  ;;  %v41_v60 = vsub.s32 2, %v32_v58  ;;  %v37_v62 = vsub.s32 1, %v32_v58 }
   0xa   :  { %551 = vmatpush3.msra.mxu1 %v294_v10  ;;  %489 = vmatprep.subr.mxu0 %v277_v12  ;;  %v259_v20 = vld [vmem:[%s859_s3 + $0x60] sm:$0xff]  ;;  %v258_v23 = vld [vmem:[%s859_s3 + $0x58] sm:$0xff]  ;;  %v289_v25 = vld [vmem:[%s859_s3 + $0x150] sm:$0xff] }
   0xb   :  { %473 = vmatmul.mubr.msk.f32.gmra.mxu0 %vm46_vm0, %v22_v7  ;;  %552 = vmatprep.subr.mxu1 %v293_v13  ;;  %v257_v26 = vld [vmem:[%s859_s3 + $0x50] sm:$0xff]  ;;  %v272_v27 = vld [vmem:[%s859_s3 + $0xc8] sm:$0xff]  ;;  %v271_v30 = vld [vmem:[%s859_s3 + $0xc0] sm:$0xff] }
   0xc   :  { %490 = vmatpush3.msra.mxu0 %v261_v14  ;;  %553 = vmatpush3.msra.mxu1 %v293_v13  ;;  %v288_v28 = vld [vmem:[%s859_s3 + $0x148] sm:$0xff]  ;;  %v287_v31 = vld [vmem:[%s859_s3 + $0x140] sm:$0xff]  ;;  %v270_v33 = vld [vmem:[%s859_s3 + $0xb8] sm:$0xff] }
   0xd   :  { %491 = vmatprep.subr.mxu0 %v276_v15  ;;  %554 = vmatprep.subr.mxu1 %v292_v16  ;;  %v256_v29 = vld [vmem:[%s859_s3 + $0x48] sm:$0xff]  ;;  %v255_v32 = vld [vmem:[%s859_s3 + $0x40] sm:$0xff]  ;;  %v286_v34 = vld [vmem:[%s859_s3 + $0x138] sm:$0xff] }
   0xe   :  { %492 = vmatpush3.msra.mxu0 %v260_v17  ;;  %555 = vmatpush3.msra.mxu1 %v292_v16  ;;  %v254_v35 = vld [vmem:[%s859_s3 + $0x38] sm:$0xff]  ;;  %v269_v36 = vld [vmem:[%s859_s3 + $0xb0] sm:$0xff]  ;;  %v268_v39 = vld [vmem:[%s859_s3 + $0xa8] sm:$0xff] }
   0xf   :  { %493 = vmatprep.subr.mxu0 %v275_v18  ;;  %556 = vmatprep.subr.mxu1 %v291_v19  ;;  %v285_v37 = vld [vmem:[%s859_s3 + $0x130] sm:$0xff]  ;;  %v284_v40 = vld [vmem:[%s859_s3 + $0x128] sm:$0xff]  ;;  %v267_v42 = vld [vmem:[%s859_s3 + $0xa0] sm:$0xff] }
  0x10   :  { %494 = vmatpush3.msra.mxu0 %v259_v20  ;;  %557 = vmatpush3.msra.mxu1 %v291_v19  ;;  %v253_v38 = vld [vmem:[%s859_s3 + $0x30] sm:$0xff]  ;;  %v252_v41 = vld [vmem:[%s859_s3 + $0x28] sm:$0xff]  ;;  %v283_v43 = vld [vmem:[%s859_s3 + $0x120] sm:$0xff] }
  0x11   :  { %495 = vmatprep.subr.mxu0 %v274_v21  ;;  %558 = vmatprep.subr.mxu1 %v290_v22  ;;  %v251_v44 = vld [vmem:[%s859_s3 + $0x20] sm:$0xff]  ;;  %v266_v45 = vld [vmem:[%s859_s3 + $0x98] sm:$0xff]  ;;  %v265_v48 = vld [vmem:[%s859_s3 + $0x90] sm:$0xff] }
  0x12   :  { %496 = vmatpush3.msra.mxu0 %v258_v23  ;;  %559 = vmatpush3.msra.mxu1 %v290_v22  ;;  %v282_v46 = vld [vmem:[%s859_s3 + $0x118] sm:$0xff]  ;;  %v281_v49 = vld [vmem:[%s859_s3 + $0x110] sm:$0xff]  ;;  %v264_v51 = vld [vmem:[%s859_s3 + $0x88] sm:$0xff] }
  0x13   :  { %497 = vmatprep.subr.mxu0 %v273_v24  ;;  %560 = vmatprep.subr.mxu1 %v289_v25  ;;  %v250_v47 = vld [vmem:[%s859_s3 + $0x18] sm:$0xff]  ;;  %v249_v50 = vld [vmem:[%s859_s3 + $0x10] sm:$0xff]  ;;  %v280_v52 = vld [vmem:[%s859_s3 + $0x108] sm:$0xff] }
  0x14   :  { %498 = vmatpush3.msra.mxu0 %v257_v26  ;;  %561 = vmatpush3.msra.mxu1 %v289_v25  ;;  %v248_v53 = vld [vmem:[%s859_s3 + $0x8] sm:$0xff]  ;;  %v263_v54 = vld [vmem:[%s859_s3 + $0x80] sm:$0xff] }
  0x15   :  { %499 = vmatprep.subr.mxu0 %v272_v27  ;;  %562 = vmatprep.subr.mxu1 %v288_v28  ;;  %v279_v55 = vld [vmem:[%s859_s3 + $0x100] sm:$0xff] }
  0x16   :  { %500 = vmatpush3.msra.mxu0 %v256_v29  ;;  %563 = vmatpush3.msra.mxu1 %v288_v28  ;;  %v247_v56 = vld [vmem:[%s859_s3] sm:$0xff] }
  0x17   :  { %501 = vmatprep.subr.mxu0 %v271_v30  ;;  %564 = vmatprep.subr.mxu1 %v287_v31  ;;  %v29_v61 = vld [vmem:[%s858_s2] sm:$0x7] }
  0x18   :  { %502 = vmatpush3.msra.mxu0 %v255_v32  ;;  %565 = vmatpush3.msra.mxu1 %v287_v31  ;;  %v34_v63 = vrot.slane %v29_v61, %v33_v59  ;;  %v42_v0 = vrot.slane %v29_v61, %v41_v60  ;;  %v38_v1 = vrot.slane %v29_v61, %v37_v62 }
  0x19   :  { %503 = vmatprep.subr.mxu0 %v270_v33  ;;  %566 = vmatprep.subr.mxu1 %v286_v34 }
  0x1a   :  { %504 = vmatpush3.msra.mxu0 %v254_v35  ;;  %567 = vmatpush3.msra.mxu1 %v286_v34 }
  0x1b   :  { %505 = vmatprep.subr.mxu0 %v269_v36  ;;  %568 = vmatprep.subr.mxu1 %v285_v37 }
  0x1c   :  { %506 = vmatpush3.msra.mxu0 %v253_v38  ;;  %569 = vmatpush3.msra.mxu1 %v285_v37 }
  0x1d   :  { %507 = vmatprep.subr.mxu0 %v268_v39  ;;  %570 = vmatprep.subr.mxu1 %v284_v40 }
  0x1e   :  { %508 = vmatpush3.msra.mxu0 %v252_v41  ;;  %571 = vmatpush3.msra.mxu1 %v284_v40 }
  0x1f   :  { %509 = vmatprep.subr.mxu0 %v267_v42  ;;  %572 = vmatprep.subr.mxu1 %v283_v43 }
  0x20   :  { %510 = vmatpush3.msra.mxu0 %v251_v44  ;;  %573 = vmatpush3.msra.mxu1 %v283_v43 }
  0x21   :  { %511 = vmatprep.subr.mxu0 %v266_v45  ;;  %574 = vmatprep.subr.mxu1 %v282_v46 }
  0x22   :  { %512 = vmatpush3.msra.mxu0 %v250_v47  ;;  %575 = vmatpush3.msra.mxu1 %v282_v46  ;;  %v482_v47 = vld [vmem:[%s860_s4] ss:$0 sm:$0xff]  ;;  %s617_s4 = scalar_lea.vmem %s462_s25, 256 }
  0x23   :  { %513 = vmatprep.subr.mxu0 %v265_v48  ;;  %576 = vmatprep.subr.mxu1 %v281_v49  ;;  %p618_p0 = scmp.ne.s32.totalorder %s462_s25, %s617_s4  ;;  %p623_p2 = scmp.lt.s32.totalorder %s617_s4, %s617_s4 }
  0x24   :  { %514 = vmatpush3.msra.mxu0 %v249_v50  ;;  %577 = vmatpush3.msra.mxu1 %v281_v49 }
  0x25   :  { %515 = vmatprep.subr.mxu0 %v264_v51  ;;  %578 = vmatprep.subr.mxu1 %v280_v52  ;;  %p624_p3 = por %p623_p2, %p622_p1 }
  0x26   :  { %516 = vmatpush3.msra.mxu0 %v248_v53  ;;  %579 = vmatpush3.msra.mxu1 %v280_v52 }
  0x27   :  { %517 = vmatprep.subr.mxu0 %v263_v54  ;;  %580 = vmatprep.subr.mxu1 %v279_v55  ;;  %p625_p4 = pnand %p624_p3, %p618_p0 }
  0x28   :  { %518 = vmatpush3.msra.mxu0 %v247_v56  ;;  %581 = vmatpush3.msra.mxu1 %v279_v55 }
  0xc7   :  { %v119_v2 = vpop.f32.mrf.mxu0  ;;  %v549_v3 = vpop.f32.mrf.mxu1 }
  0xc8   :  { %v120_v4 = vadd.f32 %v119_v2, %v34_v63  ;;  %v202_v5 = vadd.f32 %v549_v3, %v42_v0 }
  0xc9   :  { %v121_v6 = vpop.f32.mrf.mxu0  ;;  %v196_v7 = vpop.f32.mrf.mxu1 }
  0xca   :  { %v476_v8 = vmul.f32 -1.442695, %v120_v4  ;;  %v481_v9 = vmul.f32 -1.442695, %v202_v5  ;;  %v122_v10 = vadd.f32 %v121_v6, %v38_v1  ;;  %v197_v11 = vadd.f32 %v196_v7, %v42_v0 }
  0xcb   :  { %v125_v12 = vpop.f32.mrf.mxu0 }
  0xcc   :  { %589 = vpow2.f32 %v476_v8  ;;  %v477_v13 = vmul.f32 -1.442695, %v122_v10  ;;  %v478_v14 = vmul.f32 -1.442695, %v197_v11  ;;  %v126_v15 = vadd.f32 %v125_v12, %v34_v63 }
  0xcd   :  { %591 = vpow2.f32 %v481_v9  ;;  %v127_v16 = vpop.f32.mrf.mxu0 }
  0xce   :  { %593 = vpow2.f32 %v477_v13  ;;  %v479_v17 = vmul.f32 -1.442695, %v126_v15  ;;  %v128_v18 = vadd.f32 %v127_v16, %v38_v1 }
  0xcf   :  { %595 = vpow2.f32 %v478_v14 }
  0xd0   :  { %597 = vpow2.f32 %v479_v17  ;;  %v480_v19 = vmul.f32 -1.442695, %v128_v18 }
  0xd2   :  { %599 = vpow2.f32 %v480_v19 }
  0xd9   :  { %v590_v20 = vpop.eup %589 }
  0xda   :  { %v592_v21 = vpop.eup %591  ;;  %v223_v22 = vadd.f32 1.0, %v590_v20 }
  0xdb   :  { %v594_v23 = vpop.eup %593  ;;  %v228_v24 = vadd.f32 1.0, %v592_v21 }
  0xdc   :  { %v596_v25 = vpop.eup %595  ;;  %601 = vrcp.f32 %v223_v22  ;;  %v224_v26 = vadd.f32 1.0, %v594_v23 }
  0xdd   :  { %v598_v27 = vpop.eup %597  ;;  %603 = vrcp.f32 %v228_v24  ;;  %v225_v28 = vadd.f32 1.0, %v596_v25 }
  0xde   :  { %605 = vrcp.f32 %v224_v26  ;;  %v226_v29 = vadd.f32 1.0, %v598_v27 }
  0xdf   :  { %v600_v30 = vpop.eup %599  ;;  %607 = vrcp.f32 %v225_v28 }
  0xe0   :  { %v227_v31 = vadd.f32 1.0, %v600_v30  ;;  %609 = vrcp.f32 %v226_v29 }
  0xe2   :  { %611 = vrcp.f32 %v227_v31 }
  0xe9   :  { %v602_v32 = vpop.eup %601 }
  0xea   :  { %v604_v33 = vpop.eup %603  ;;  %v241_v37 = vmul.f32 %v602_v32, %v120_v4 }
  0xeb   :  { %v606_v34 = vpop.eup %605  ;;  %v246_v40 = vmul.f32 %v604_v33, %v202_v5 }
  0xec   :  { %v608_v35 = vpop.eup %607  ;;  %v242_v36 = vmul.f32 %v606_v34, %v122_v10 }
  0xed   :  { %v243_v38 = vmul.f32 %v608_v35, %v197_v11  ;;  %v610_v39 = vpop.eup %609 }
  0xee   :  { %366 = vmatprep.mubr.f32.mxu0 %v242_v36  ;;  %v244_v43 = vmul.f32 %v610_v39, %v126_v15 }
  0xef   :  { %v612_v41 = vpop.eup %611  ;;  %582 = vmatprep.mubr.f32.mxu1 %v243_v38  ;;  %367 = vmatmul.mubr.f32.vlgmr.msra.gmra.mxu0 %v241_v37 }
  0xf0   :  { %v245_v42 = vmul.f32 %v612_v41, %v128_v18  ;;  %583 = vmatmul.mubr.f32.vlgmr.msra.gmra.mxu1 %v246_v40 }
  0xf2   :  { %371 = vmatprep.mubr.f32.mxu0 %v245_v42 }
  0xf3   :  { %372 = vmatmul.mubr.f32.gmra.mxu0 %v244_v43 }
 0x1af   :  { %v519_v44 = vpop.f32.mrf.mxu0 }
 0x1b0   :  { %v584_v45 = vpop.f32.mrf.mxu1 }
 0x1b1   :  { %v520_v46 = vpop.f32.mrf.mxu0 }
 0x1b2   :  { %v521_v48 = vadd.f32 %v520_v46, %v519_v44  ;;  %v443_v51 = vpop.f32.mrf.mxu1 }
 0x1b3   :  { %v522_v49 = vpop.f32.mrf.mxu0 }
 0x1b4   :  { %v369_v50 = vadd.f32 %v521_v48, %v482_v47 }
 0x1b5   :  { %v523_v52 = vpop.f32.mrf.mxu0 }
 0x1b6   :  { %v444_v53 = vadd.f32 %v443_v51, %v369_v50  ;;  %v524_v54 = vadd.f32 %v523_v52, %v522_v49 }
 0x1b8   :  { %613 = vtanh.f32 %v444_v53  ;;  %v374_v55 = vadd.f32 %v524_v54, %v482_v47 }
 0x1ba   :  { %v449_v56 = vadd.f32 %v584_v45, %v374_v55 }
 0x1bc   :  { %615 = vtanh.f32 %v449_v56 }
 0x1c5   :  { %v614_v57 = vpop.eup %613 }
 0x1c6   :  { %454 = vst.msk [vmem:[#allocation2] sm:$0xff] %vm46_vm0, %v614_v57 }
 0x1c9   :  { %v616_v58 = vpop.eup %615 }
 0x1ca   :  { %455 = vst.msk [vmem:[#allocation2 + $0x8] sm:$0xff] %vm46_vm0, %v616_v58 }
 0x1cb   :  { %628 = shalt.err (!%p625_p4)
}
 0x1cc   :  { %s641_s26 = smov 128   ;;  %s642_s27 = smov 8  }
 0x1cd   :  { %467 = dma.vmem_to_hbm [thread:$0]  %s462_s25, 256, %s861_s5, [#allocation3], %s641_s26, %s641_s26, %s642_s27  }
 0x1ce   :  { %637 = dma.done.wait [#allocation3], 256  }
 0x1cf   :  { %638 = vsyncadd [#allocation3], 4294967040 }
 0x1d0   :  { %471 = vsyncpa [#allocation3], 1 }

</bundles_post_ra>
